<compile_context>
chip_gen: v6e
topology: v6e:2x2x1
jax: 0.10.0
libtpu: 0.0.40
codegen_flags: <defaults>
</compile_context>

<pallas_src>
import jax
import jax.numpy as jnp
from jax.experimental import pallas as pl
from jax.experimental.pallas import tpu as pltpu

BN_EPS = 1e-5


def blockgen_kernel(x_ref, wt_ref, gamma_ref, beta_ref, o_ref):
    # Linear (bias-free): (B, in_dim) @ (in_dim, TN) on the MXU, f32 accumulation.
    z = jnp.dot(x_ref[...], wt_ref[...], preferred_element_type=jnp.float32)

    # One-pass per-feature batch stats over the batch (sublane) axis: E[z], E[z^2].
    inv_b = 1.0 / z.shape[0]
    mean = jnp.sum(z, axis=0, keepdims=True) * inv_b                 # (1, TN)
    var = jnp.sum(z * z, axis=0, keepdims=True) * inv_b - mean * mean
    var = jnp.maximum(var, 0.0)                                      # guard fp cancellation

    # Fold BN affine into a single FMA: y = z * s + t  (rsqrt goes to the EUP slot).
    s = gamma_ref[...] * jax.lax.rsqrt(var + BN_EPS)                 # (1, TN)
    t = beta_ref[...] - mean * s                                     # (1, TN)

    o_ref[...] = jnp.maximum(z * s + t, 0.0).astype(o_ref.dtype)


def block_gen_forward(x, weight, bias, gamma, beta):
    """x: (B, in_dim); weight: (out_dim, in_dim) [PyTorch layout]; bias/gamma/beta: (out_dim,).

    The Linear bias is accepted for API parity but never used: training-mode BatchNorm
    subtracts the per-feature batch mean, which cancels the bias exactly.
    """
    del bias
    B, in_dim = x.shape
    out_dim = weight.shape[0]

    LANE = 128
    # Lane-dense feature tile: 256-wide to fill the v6e/v7x MXU when there is enough work,
    # otherwise 128 (matches v5e's 128-wide MXU and keeps VMEM small).
    tn = 256 if out_dim >= 256 else LANE
    out_pad = pl.cdiv(out_dim, tn) * tn
    grid = (out_pad // tn,)

    # W^T in (in_dim, out_pad) layout, zero-padded features; gamma padded with ones,
    # beta with zeros (padded columns are all-zero -> normalised to 0 -> relu 0 -> sliced off).
    wt = jnp.zeros((in_dim, out_pad), weight.dtype).at[:, :out_dim].set(weight.T)
    g2 = jnp.ones((1, out_pad), gamma.dtype).at[0, :out_dim].set(gamma)
    be2 = jnp.zeros((1, out_pad), beta.dtype).at[0, :out_dim].set(beta)

    itemsize = jnp.dtype(x.dtype).itemsize
    cost = pl.CostEstimate(
        flops=2 * B * in_dim * out_pad,
        transcendentals=out_pad,  # one rsqrt per feature
        bytes_accessed=(x.size + wt.size + g2.size + be2.size + B * out_pad) * itemsize,
    )

    # TODO(synk): for realistic layer sizes pass x / W^T as bf16 (f32 accumulation is
    # already forced via preferred_element_type) to halve the DMA-bound HBM traffic.
    out = pl.pallas_call(
        blockgen_kernel,
        out_shape=jax.ShapeDtypeStruct((B, out_pad), x.dtype),
        grid_spec=pltpu.PrefetchScalarGridSpec(
            num_scalar_prefetch=0,
            grid=grid,
            in_specs=[
                pl.BlockSpec((B, in_dim), lambda j: (0, 0)),    # x: resident across the grid
                pl.BlockSpec((in_dim, tn), lambda j: (0, j)),   # W^T feature slab (double-buffered)
                pl.BlockSpec((1, tn), lambda j: (0, j)),        # gamma
                pl.BlockSpec((1, tn), lambda j: (0, j)),        # beta
            ],
            out_specs=pl.BlockSpec((B, tn), lambda j: (0, j)),
        ),
        compiler_params=pltpu.CompilerParams(
            dimension_semantics=("parallel",),
        ),
        cost_estimate=cost,
    )(x, wt, g2, be2)

    return out[:, :out_dim]


if __name__ == "__main__":
    # Small shapes implied by the module: x is (batch, in_dim).
    B, IN_DIM, OUT_DIM = 8, 32, 64

    key = jax.random.PRNGKey(0)
    kx, kw, kb = jax.random.split(key, 3)

    x = jax.random.normal(kx, (B, IN_DIM), dtype=jnp.float32)

    # Deterministic parameter init (synthetic; mirrors PyTorch shapes/defaults).
    bound = 1.0 / (IN_DIM ** 0.5)
    weight = jax.random.uniform(kw, (OUT_DIM, IN_DIM), dtype=jnp.float32,
                                minval=-bound, maxval=bound)   # nn.Linear weight
    bias = jax.random.uniform(kb, (OUT_DIM,), dtype=jnp.float32,
                              minval=-bound, maxval=bound)     # nn.Linear bias
    gamma = jnp.ones((OUT_DIM,), dtype=jnp.float32)            # BatchNorm1d weight init
    beta = jnp.zeros((OUT_DIM,), dtype=jnp.float32)            # BatchNorm1d bias init

    out = block_gen_forward(x, weight, bias, gamma, beta)
    jax.block_until_ready(out)

    # Pure-JAX reference of the original PyTorch semantics (with the Linear bias;
    # it cancels exactly under batch-mean subtraction, so outputs match).
    z = x @ weight.T + bias
    mu = jnp.mean(z, axis=0, keepdims=True)
    var = jnp.mean((z - mu) ** 2, axis=0, keepdims=True)
    ref = jnp.maximum((z - mu) / jnp.sqrt(var + BN_EPS) * gamma + beta, 0.0)

    assert out.shape == (B, OUT_DIM)
    assert jnp.allclose(out, ref, atol=1e-5, rtol=1e-5), float(jnp.max(jnp.abs(out - ref)))

    print("KERNEL_OK")
</pallas_src>

<mosaic_0001>
module attributes {stable_mosaic.version = 11 : i64} {
  func.func @blockgen_kernel(%arg0: i32, %arg1: memref<8x32xf32, #tpu.memory_space<vmem>>, %arg2: memref<32x128xf32, #tpu.memory_space<vmem>>, %arg3: memref<1x128xf32, #tpu.memory_space<vmem>>, %arg4: memref<1x128xf32, #tpu.memory_space<vmem>>, %arg5: memref<8x128xf32, #tpu.memory_space<vmem>>) attributes {dimension_semantics = [#tpu.dimension_semantics<parallel>], iteration_bounds = array<i64: 1>, scalar_prefetch = 0 : i64, scratch_operands = 0 : i64, tpu.core_type = #tpu.core_type<tc>, window_params = [{pipeline_mode = #tpu.pipeline_mode<synchronous>, transform_indices = @transform_0, window_bounds = array<i64: 8, 32>}, {transform_indices = @transform_1, window_bounds = array<i64: 32, 128>}, {transform_indices = @transform_2, window_bounds = array<i64: 1, 128>}, {transform_indices = @transform_3, window_bounds = array<i64: 1, 128>}, {transform_indices = @transform_4, window_bounds = array<i64: 8, 128>}]} {
    %c0 = arith.constant 0 : index
    %c0_0 = arith.constant 0 : index
    %0 = vector.load %arg1[%c0, %c0_0] : memref<8x32xf32, #tpu.memory_space<vmem>>, vector<8x32xf32>
    %c0_1 = arith.constant 0 : index
    %c0_2 = arith.constant 0 : index
    %1 = vector.load %arg2[%c0_1, %c0_2] : memref<32x128xf32, #tpu.memory_space<vmem>>, vector<32x128xf32>
    %cst = arith.constant dense<0.000000e+00> : vector<8x128xf32>
    %2 = tpu.matmul %0, %1, %cst {dimension_numbers = #tpu.dot_dimension_numbers<[1], [0], [0], [1], [0, 0, 1, 1], [], []>} : vector<8x32xf32>, vector<32x128xf32>, vector<8x128xf32> -> vector<8x128xf32>
    %cst_3 = arith.constant dense<0.000000e+00> : vector<128xf32>
    %3 = vector.multi_reduction <add>, %2, %cst_3 [0] : vector<8x128xf32> to vector<128xf32>
    %4 = vector.shape_cast %3 : vector<128xf32> to vector<1x128xf32>
    %cst_4 = arith.constant 1.250000e-01 : f32
    %5 = vector.broadcast %cst_4 : f32 to vector<1x128xf32>
    %6 = arith.mulf %4, %5 : vector<1x128xf32>
    %7 = arith.mulf %2, %2 : vector<8x128xf32>
    %cst_5 = arith.constant dense<0.000000e+00> : vector<128xf32>
    %8 = vector.multi_reduction <add>, %7, %cst_5 [0] : vector<8x128xf32> to vector<128xf32>
    %9 = vector.shape_cast %8 : vector<128xf32> to vector<1x128xf32>
    %cst_6 = arith.constant 1.250000e-01 : f32
    %10 = vector.broadcast %cst_6 : f32 to vector<1x128xf32>
    %11 = arith.mulf %9, %10 : vector<1x128xf32>
    %12 = arith.mulf %6, %6 : vector<1x128xf32>
    %13 = arith.subf %11, %12 : vector<1x128xf32>
    %cst_7 = arith.constant 0.000000e+00 : f32
    %14 = vector.broadcast %cst_7 : f32 to vector<1x128xf32>
    %15 = arith.maximumf %13, %14 : vector<1x128xf32>
    %c0_8 = arith.constant 0 : index
    %c0_9 = arith.constant 0 : index
    %16 = vector.load %arg3[%c0_8, %c0_9] : memref<1x128xf32, #tpu.memory_space<vmem>>, vector<1x128xf32>
    %cst_10 = arith.constant 9.99999974E-6 : f32
    %17 = vector.broadcast %cst_10 : f32 to vector<1x128xf32>
    %18 = arith.addf %15, %17 : vector<1x128xf32>
    %19 = math.rsqrt %18 : vector<1x128xf32>
    %20 = arith.mulf %16, %19 : vector<1x128xf32>
    %c0_11 = arith.constant 0 : index
    %c0_12 = arith.constant 0 : index
    %21 = vector.load %arg4[%c0_11, %c0_12] : memref<1x128xf32, #tpu.memory_space<vmem>>, vector<1x128xf32>
    %22 = arith.mulf %6, %20 : vector<1x128xf32>
    %23 = arith.subf %21, %22 : vector<1x128xf32>
    %24 = vector.broadcast %20 : vector<1x128xf32> to vector<8x128xf32>
    %25 = arith.mulf %2, %24 : vector<8x128xf32>
    %26 = vector.broadcast %23 : vector<1x128xf32> to vector<8x128xf32>
    %27 = arith.addf %25, %26 : vector<8x128xf32>
    %cst_13 = arith.constant 0.000000e+00 : f32
    %28 = vector.broadcast %cst_13 : f32 to vector<8x128xf32>
    %29 = arith.maximumf %27, %28 : vector<8x128xf32>
    %c0_14 = arith.constant 0 : index
    %c0_15 = arith.constant 0 : index
    %30 = vector.load %arg5[%c0_14, %c0_15] : memref<8x128xf32, #tpu.memory_space<vmem>>, vector<8x128xf32>
    tpu.vector_store %arg5[%c0_14, %c0_15], %29 {strides = array<i32>} : memref<8x128xf32, #tpu.memory_space<vmem>>, vector<8x128xf32>,
    return
  }
  func.func @transform_0(%arg0: i32) -> (i32, i32) {
    %c0_i32 = arith.constant 0 : i32
    %c0_i32_0 = arith.constant 0 : i32
    %c0_i32_1 = arith.constant 0 : i32
    return %c0_i32, %c0_i32_0 : i32, i32
  }
  func.func @transform_1(%arg0: i32) -> (i32, i32) {
    %c0_i32 = arith.constant 0 : i32
    %c0_i32_0 = arith.constant 0 : i32
    return %c0_i32, %arg0 : i32, i32
  }
  func.func @transform_2(%arg0: i32) -> (i32, i32) {
    %c0_i32 = arith.constant 0 : i32
    %c0_i32_0 = arith.constant 0 : i32
    return %c0_i32, %arg0 : i32, i32
  }
  func.func @transform_3(%arg0: i32) -> (i32, i32) {
    %c0_i32 = arith.constant 0 : i32
    %c0_i32_0 = arith.constant 0 : i32
    return %c0_i32, %arg0 : i32, i32
  }
  func.func @transform_4(%arg0: i32) -> (i32, i32) {
    %c0_i32 = arith.constant 0 : i32
    %c0_i32_0 = arith.constant 0 : i32
    return %c0_i32, %arg0 : i32, i32
  }
}

</mosaic_0001>

<bundles_post_ra>
// kernel: tpu_custom_call.1
= control target key start
LH: loop header
LB: loop body
LE: loop exit
PB: predicated region body
PF: predicated region fallthrough
CT: control target
= control target key end

     0   :  { %9 = vsyncpa [#allocation3], 0  ;;  %s319_s0 = inlined_call_operand.hbm [shape: f32[8,32], index: 0, kind: input, shape index: {}]   ;;  %s320_s1 = inlined_call_operand.hbm [shape: f32[32,128], index: 1, kind: input, shape index: {}]   ;;  %s321_s2 = inlined_call_operand.vmem [shape: f32[1,128], index: 2, kind: input, shape index: {}]   ;;  %s322_s3 = inlined_call_operand.vmem [shape: f32[1,128], index: 3, kind: input, shape index: {}]   ;;  %s323_s4 = inlined_call_operand.hbm [shape: f32[8,128], index: 4, kind: output, shape index: {}]  }
   0x1   :  { %10 = vsyncpa [#allocation6], 0 }
   0x2   :  { %11 = vsyncpa [#allocation4], 0  ;;  %s272_s15 = smov [#allocation2]   ;;  %s273_s17 = smov [#allocation5]  }
   0x3   :  { %s18_s16 = sshll.u32 %s272_s15, 4  ;;  %s27_s18 = sshll.u32 %s273_s17, 4  ;;  %s19_s16 = int_to_ptr.vmem [resolvable:$true] %s18_s16  ;;  %s28_s18 = int_to_ptr.vmem [resolvable:$true] %s27_s18 }
   0x4   :  { %s214_s19 = scalar_lea.vmem %s19_s16, 128  ;;  %p219_p1 = scmp.lt.s32.totalorder %s19_s16, %s19_s16 }
   0x5   :  { %p215_p0 = scmp.ne.s32.totalorder %s19_s16, %s214_s19  ;;  %p220_p2 = scmp.lt.s32.totalorder %s214_s19, %s214_s19 }
   0x7   :  { %p221_p3 = por %p220_p2, %p219_p1 }
   0x9   :  { %p222_p4 = pnand %p221_p3, %p215_p0 }
   0xb   :  { %225 = shalt.err (!%p222_p4)
}
   0xc   :  { %21 = dma.hbm_to_vmem [thread:$0]  %s319_s0, 128, %s19_s16, [#allocation3]  }
   0xd   :  { %s234_s22 = scalar_lea.vmem %s28_s18, 512  ;;  %p239_p6 = scmp.lt.s32.totalorder %s28_s18, %s28_s18 }
   0xe   :  { %p235_p5 = scmp.ne.s32.totalorder %s28_s18, %s234_s22  ;;  %p240_p7 = scmp.lt.s32.totalorder %s234_s22, %s234_s22 }
  0x10   :  { %p241_p8 = por %p240_p7, %p239_p6 }
  0x12   :  { %p242_p9 = pnand %p241_p8, %p235_p5 }
  0x14   :  { %245 = shalt.err (!%p242_p9)
}
  0x15   :  { %s274_s23 = smov 128   ;;  %s275_s24 = smov 8  }
  0x16   :  { %33 = dma.hbm_to_vmem [thread:$0]  %s320_s1, 512, %s28_s18, [#allocation6], %s274_s23, %s274_s23, %s275_s24  }
  0x17   :  { %266 = dma.done.wait [#allocation3], 128  }
  0x18   :  { %267 = vsyncadd [#allocation3], 4294967168 }
  0x19   :  { %268 = dma.done.wait [#allocation6], 512  }
  0x1a   :  { %269 = vsyncadd [#allocation6], 4294966784  ;;  %v276_v0 = vmov 0.0   ;;  %vm277_vm0 = vmmov 0   ;;  %v48_v1 = vld [vmem:[#allocation5 + $0x18] sm:$0xff]  ;;  %v47_v2 = vld [vmem:[#allocation5 + $0x10] sm:$0xff]  ;;  %v149_v27 = vlaneseq }
  0x1b   :  { %186 = vmatprep.subr.mxu0 %v276_v0  ;;  %194 = vmatprep.mubr.msk.f32.mxu0 %vm277_vm0, %v276_v0  ;;  %v46_v3 = vld [vmem:[#allocation5 + $0x8] sm:$0xff]  ;;  %v45_v4 = vld [vmem:[#allocation5] sm:$0xff]  ;;  %v44_v5 = vld [vmem:[#allocation2] sm:$0xff]  ;;  %vm49_vm1 = vcmask 261120   ;;  %s278_s29 = smov [#allocation7]  }
  0x1c   :  { %187 = vmatpush3.msra.mxu0 %v48_v1  ;;  %v150_v28 = vshrl.u32 %v149_v27, 7  ;;  %v141_v29 = vld [vmem:[%s321_s2] sm:$0x1]  ;;  %s170_s30 = sshll.u32 %s278_s29, 4  ;;  %s171_s30 = int_to_ptr.vmem [resolvable:$true] %s170_s30 }
  0x1d   :  { %188 = vmatprep.subr.mxu0 %v276_v0  ;;  %v145_v33 = vld [vmem:[%s322_s3] sm:$0x1]  ;;  %s246_s5 = scalar_lea.vmem %s171_s30, 128  ;;  %p251_p11 = scmp.lt.s32.totalorder %s171_s30, %s171_s30 }
  0x1e   :  { %189 = vmatpush3.msra.mxu0 %v47_v2  ;;  %v151_v30 = vsub.s32 0, %v150_v28  ;;  %p247_p10 = scmp.ne.s32.totalorder %s171_s30, %s246_s5  ;;  %p252_p12 = scmp.lt.s32.totalorder %s246_s5, %s246_s5 }
  0x1f   :  { %190 = vmatprep.subr.mxu0 %v276_v0 }
  0x20   :  { %191 = vmatpush3.msra.mxu0 %v46_v3  ;;  %p253_p13 = por %p252_p12, %p251_p11 }
  0x21   :  { %192 = vmatprep.subr.mxu0 %v276_v0 }
  0x22   :  { %193 = vmatpush3.msra.mxu0 %v45_v4  ;;  %p254_p0 = pnand %p253_p13, %p247_p10 }
  0x23   :  { %195 = vmatmul.mubr.msk.f32.vlgmr.msra.gmra.mxu0 %vm49_vm1, %v44_v5 }
  0xe3   :  { %v119_v6 = vpop.f32.mrf.mxu0 }
  0xe4   :  { %v123_v7 = vrot.slane %v119_v6, 4  ;;  %v130_v8 = vmul.f32 %v119_v6, %v119_v6 }
  0xe5   :  { %v196_v9 = vpop.f32.mrf.mxu0 }
  0xe6   :  { %v124_v10 = vadd.f32 %v123_v7, %v119_v6  ;;  %v131_v11 = vrot.slane %v130_v8, 4 }
  0xe8   :  { %v125_v12 = vrot.slane %v124_v10, 2  ;;  %v132_v13 = vadd.f32 %v131_v11, %v130_v8 }
  0xea   :  { %v126_v14 = vadd.f32 %v125_v12, %v124_v10  ;;  %v133_v15 = vrot.slane %v132_v13, 2 }
  0xec   :  { %v127_v16 = vrot.slane %v126_v14, 1  ;;  %v134_v17 = vadd.f32 %v133_v15, %v132_v13 }
  0xee   :  { %v128_v18 = vadd.f32 %v127_v16, %v126_v14  ;;  %v135_v19 = vrot.slane %v134_v17, 1 }
  0xf0   :  { %v129_v20 = vmul.f32 0.125, %v128_v18  ;;  %v136_v21 = vadd.f32 %v135_v19, %v134_v17 }
  0xf2   :  { %v137_v22 = vmul.f32 0.125, %v136_v21  ;;  %v138_v23 = vmul.f32 %v129_v20, %v129_v20 }
  0xf4   :  { %v139_v24 = vsub.f32 %v137_v22, %v138_v23 }
  0xf6   :  { %v140_v25 = vmax.f32 %v139_v24, 0.0 }
  0xf8   :  { %v142_v26 = vadd.f32 1e-05, %v140_v25 }
  0xfa   :  { %204 = vrsqrt.f32 %v142_v26 }
 0x107   :  { %v205_v31 = vpop.eup %204 }
 0x108   :  { %v144_v32 = vmul.f32 %v205_v31, %v141_v29 }
 0x10a   :  { %v152_v34 = vrot.slane %v144_v32, %v151_v30  ;;  %v146_v35 = vmul.f32 %v144_v32, %v129_v20 }
 0x10c   :  { %v147_v36 = vsub.f32 %v145_v33, %v146_v35  ;;  %v154_v37 = vmul.f32 %v152_v34, %v119_v6 }
 0x10e   :  { %v159_v38 = vrot.slane %v147_v36, %v151_v30 }
 0x110   :  { %v161_v39 = vadd.f32 %v159_v38, %v154_v37 }
 0x112   :  { %v162_v40 = vmax.f32 %v161_v39, 0.0 }
 0x114   :  { %163 = vst [vmem:[#allocation7] sm:$0xff] %v162_v40 }
 0x115   :  { %257 = shalt.err (!%p254_p0)
}
 0x116   :  { %173 = dma.vmem_to_hbm [thread:$0]  %s171_s30, 128, %s323_s4, [#allocation4]  }
 0x117   :  { %270 = dma.done.wait [#allocation4], 128  }
 0x118   :  { %271 = vsyncadd [#allocation4], 4294967168 }
 0x119   :  { %177 = vsyncpa [#allocation3], 1 }
 0x11a   :  { %178 = vsyncpa [#allocation6], 1 }
 0x11b   :  { %179 = vsyncpa [#allocation4], 1 }

</bundles_post_ra>
